<compile_context>
chip_gen: v7x
topology: tpu7x:2x2x1
jax: 0.10.0
libtpu: 0.0.40
codegen_flags: <defaults>
</compile_context>

<pallas_src>
import functools

import jax
import jax.numpy as jnp
from jax.experimental import pallas as pl
from jax.experimental.pallas import tpu as pltpu

LANE = 128


def _round_up(x, m):
    return (x + m - 1) // m * m


# ----------------------------------------------------------------------------
# Fused kernel: conv(im2col matmul) + folded BN + ReLU + GAP + linear head
# ----------------------------------------------------------------------------
def fused_forward_kernel(p_ref, wc_ref, s_ref, b_ref, wh_ref, bh_ref, o_ref,
                         *, batch, hw):
    # p_ref : (B*H*W, KP)  bf16 im2col patches (K = 3*3*Cin, zero-padded to KP=128)
    # wc_ref: (KP, CP)     bf16 conv weights  (Cout zero-padded to CP=128)
    # s_ref : (1, CP)      f32 folded BN scale = gamma / sqrt(var + eps)
    # b_ref : (1, CP)      f32 folded BN bias  = beta - mean * scale
    # wh_ref: (CP, NP)     bf16 head weights  (num_classes zero-padded to NP=128)
    # bh_ref: (1, NP)      f32 head bias
    # o_ref : (B, NP)      f32 padded logits
    # Single MXU pass for the whole convolution.
    y = jnp.dot(p_ref[...], wc_ref[...], preferred_element_type=jnp.float32)
    # Folded BatchNorm (eval) + ReLU, f32 epilogue on the VPU.
    y = jnp.maximum(y * s_ref[...] + b_ref[...], 0.0)              # (B*H*W, CP)
    # Global average pool per image (sublane reduction; padded channels stay 0).
    pooled = jnp.mean(y.reshape(batch, hw, y.shape[-1]), axis=1)   # (B, CP)
    # Classification head, lane-dense 128-wide output.
    logits = jnp.dot(pooled.astype(wh_ref.dtype), wh_ref[...],
                     preferred_element_type=jnp.float32) + bh_ref[...]
    o_ref[...] = logits.astype(o_ref.dtype)


# ----------------------------------------------------------------------------
# Parameter init: deterministic weights + packed/padded kernel operands
# ----------------------------------------------------------------------------
def init_params(key, in_ch=4, stem_ch=32, num_classes=10):
    k1, k2, k3 = jax.random.split(key, 3)
    w_conv = jax.random.normal(k1, (3, 3, in_ch, stem_ch), jnp.float32) * 0.1
    # BatchNorm (eval mode) folded into scale/bias.
    gamma = jnp.ones((stem_ch,), jnp.float32)
    beta = jnp.zeros((stem_ch,), jnp.float32)
    running_mean = jnp.zeros((stem_ch,), jnp.float32)
    running_var = jnp.ones((stem_ch,), jnp.float32)
    eps = 1e-5
    scale = gamma / jnp.sqrt(running_var + eps)
    bias = beta - running_mean * scale
    w_head = jax.random.normal(k2, (stem_ch, num_classes), jnp.float32) * 0.1
    b_head = jax.random.normal(k3, (num_classes,), jnp.float32) * 0.01

    # Pack / zero-pad everything to lane-dense 128-wide operands (done once here,
    # not per forward call).  Padded channels/classes are exact zeros end to end.
    k = 3 * 3 * in_ch
    kp = _round_up(k, LANE)
    cp = _round_up(stem_ch, LANE)
    np_ = _round_up(num_classes, LANE)

    w_conv_p = (jnp.zeros((kp, cp), jnp.float32)
                .at[:k, :stem_ch].set(w_conv.reshape(k, stem_ch))
                .astype(jnp.bfloat16))
    bn_scale_p = jnp.zeros((1, cp), jnp.float32).at[0, :stem_ch].set(scale)
    bn_bias_p = jnp.zeros((1, cp), jnp.float32).at[0, :stem_ch].set(bias)
    w_head_p = (jnp.zeros((cp, np_), jnp.float32)
                .at[:stem_ch, :num_classes].set(w_head)
                .astype(jnp.bfloat16))
    b_head_p = jnp.zeros((1, np_), jnp.float32).at[0, :num_classes].set(b_head)

    packed = dict(w_conv_p=w_conv_p, bn_scale_p=bn_scale_p, bn_bias_p=bn_bias_p,
                  w_head_p=w_head_p, b_head_p=b_head_p)
    raw = dict(w_conv=w_conv, bn_scale=scale, bn_bias=bias,
               w_head=w_head, b_head=b_head)
    return packed, raw


# ----------------------------------------------------------------------------
# Forward: NCHW input -> logits (single fused pallas_call)
# ----------------------------------------------------------------------------
@functools.partial(jax.jit, static_argnames=("num_classes",))
def timm_model_forward(x_nchw, params, *, num_classes):
    # NCHW (PyTorch convention) -> NHWC (channels on the lane axis).
    x = jnp.transpose(x_nchw, (0, 2, 3, 1))
    B, H, W, cin = x.shape
    KH = KW = 3

    # im2col in the wrapper (pure layout plumbing): one lane-dense matmul operand
    # instead of 9 lane-sparse Cin-wide taps inside the kernel.
    xp = jnp.pad(x, ((0, 0), (1, 1), (1, 1), (0, 0)))          # 'same' halo for 3x3
    taps = [xp[:, kh:kh + H, kw:kw + W, :] for kh in range(KH) for kw in range(KW)]
    patches = jnp.concatenate(taps, axis=-1).reshape(B * H * W, KH * KW * cin)

    kp, cp = params["w_conv_p"].shape
    np_ = params["w_head_p"].shape[1]
    bhw = B * H * W
    patches = jnp.pad(patches, ((0, 0), (0, kp - patches.shape[1])))
    patches = patches.astype(jnp.bfloat16)

    kernel = functools.partial(fused_forward_kernel, batch=B, hw=H * W)
    logits_padded = pl.pallas_call(
        kernel,
        out_shape=jax.ShapeDtypeStruct((B, np_), jnp.float32),
        grid=(1,),
        in_specs=[
            pl.BlockSpec((bhw, kp), lambda i: (0, 0)),
            pl.BlockSpec((kp, cp), lambda i: (0, 0)),
            pl.BlockSpec((1, cp), lambda i: (0, 0)),
            pl.BlockSpec((1, cp), lambda i: (0, 0)),
            pl.BlockSpec((cp, np_), lambda i: (0, 0)),
            pl.BlockSpec((1, np_), lambda i: (0, 0)),
        ],
        out_specs=pl.BlockSpec((B, np_), lambda i: (0, 0)),
        compiler_params=pltpu.CompilerParams(
            dimension_semantics=("arbitrary",),
            vmem_limit_bytes=32 * 1024 * 1024,
        ),
    )(patches, params["w_conv_p"], params["bn_scale_p"], params["bn_bias_p"],
      params["w_head_p"], params["b_head_p"])

    return logits_padded[:, :num_classes]


# ----------------------------------------------------------------------------
# Pure-JAX reference (f32) for a correctness check
# ----------------------------------------------------------------------------
def reference_forward(x_nchw, raw):
    x = jnp.transpose(x_nchw, (0, 2, 3, 1))
    y = jax.lax.conv_general_dilated(
        x, raw["w_conv"], window_strides=(1, 1), padding="SAME",
        dimension_numbers=("NHWC", "HWIO", "NHWC"))
    y = jnp.maximum(y * raw["bn_scale"] + raw["bn_bias"], 0.0)
    pooled = jnp.mean(y, axis=(1, 2))
    return pooled @ raw["w_head"] + raw["b_head"]


if __name__ == "__main__":
    key = jax.random.PRNGKey(0)
    k_x, k_p = jax.random.split(key)

    B, C, H, W = 2, 4, 16, 16
    num_classes = 10
    x = jax.random.normal(k_x, (B, C, H, W), jnp.float32)
    packed, raw = init_params(k_p, in_ch=C, stem_ch=32, num_classes=num_classes)

    logits = timm_model_forward(x, packed, num_classes=num_classes)
    jax.block_until_ready(logits)

    assert logits.shape == (B, num_classes)
    assert bool(jnp.all(jnp.isfinite(logits)))

    ref = reference_forward(x, raw)
    max_err = float(jnp.max(jnp.abs(logits - ref)))
    assert max_err < 5e-2, f"max abs error vs reference: {max_err}"
    print("KERNEL_OK")
</pallas_src>

<mosaic_0001>
module attributes {stable_mosaic.version = 11 : i64} {
  func.func @fused_forward_kernel(%arg0: i32, %arg1: memref<512x128xbf16, #tpu.memory_space<vmem>>, %arg2: memref<128x128xbf16, #tpu.memory_space<vmem>>, %arg3: memref<1x128xf32, #tpu.memory_space<vmem>>, %arg4: memref<1x128xf32, #tpu.memory_space<vmem>>, %arg5: memref<128x128xbf16, #tpu.memory_space<vmem>>, %arg6: memref<1x128xf32, #tpu.memory_space<vmem>>, %arg7: memref<2x128xf32, #tpu.memory_space<vmem>>) attributes {dimension_semantics = [#tpu.dimension_semantics<arbitrary>], iteration_bounds = array<i64: 1>, scalar_prefetch = 0 : i64, scratch_operands = 0 : i64, tpu.core_type = #tpu.core_type<tc>, window_params = [{pipeline_mode = #tpu.pipeline_mode<synchronous>, transform_indices = @transform_0, window_bounds = array<i64: 512, 128>}, {pipeline_mode = #tpu.pipeline_mode<synchronous>, transform_indices = @transform_1, window_bounds = array<i64: 128, 128>}, {pipeline_mode = #tpu.pipeline_mode<synchronous>, transform_indices = @transform_2, window_bounds = array<i64: 1, 128>}, {pipeline_mode = #tpu.pipeline_mode<synchronous>, transform_indices = @transform_3, window_bounds = array<i64: 1, 128>}, {pipeline_mode = #tpu.pipeline_mode<synchronous>, transform_indices = @transform_4, window_bounds = array<i64: 128, 128>}, {pipeline_mode = #tpu.pipeline_mode<synchronous>, transform_indices = @transform_5, window_bounds = array<i64: 1, 128>}, {pipeline_mode = #tpu.pipeline_mode<synchronous>, transform_indices = @transform_6, window_bounds = array<i64: 2, 128>}]} {
    %c0 = arith.constant 0 : index
    %c0_0 = arith.constant 0 : index
    %0 = vector.load %arg1[%c0, %c0_0] : memref<512x128xbf16, #tpu.memory_space<vmem>>, vector<512x128xbf16>
    %c0_1 = arith.constant 0 : index
    %c0_2 = arith.constant 0 : index
    %1 = vector.load %arg2[%c0_1, %c0_2] : memref<128x128xbf16, #tpu.memory_space<vmem>>, vector<128x128xbf16>
    %cst = arith.constant dense<0.000000e+00> : vector<512x128xf32>
    %2 = tpu.matmul %0, %1, %cst {dimension_numbers = #tpu.dot_dimension_numbers<[1], [0], [0], [1], [0, 0, 1, 1], [], []>} : vector<512x128xbf16>, vector<128x128xbf16>, vector<512x128xf32> -> vector<512x128xf32>
    %c0_3 = arith.constant 0 : index
    %c0_4 = arith.constant 0 : index
    %3 = vector.load %arg3[%c0_3, %c0_4] : memref<1x128xf32, #tpu.memory_space<vmem>>, vector<1x128xf32>
    %4 = vector.broadcast %3 : vector<1x128xf32> to vector<512x128xf32>
    %5 = arith.mulf %2, %4 : vector<512x128xf32>
    %c0_5 = arith.constant 0 : index
    %c0_6 = arith.constant 0 : index
    %6 = vector.load %arg4[%c0_5, %c0_6] : memref<1x128xf32, #tpu.memory_space<vmem>>, vector<1x128xf32>
    %7 = vector.broadcast %6 : vector<1x128xf32> to vector<512x128xf32>
    %8 = arith.addf %5, %7 : vector<512x128xf32>
    %cst_7 = arith.constant 0.000000e+00 : f32
    %9 = vector.broadcast %cst_7 : f32 to vector<512x128xf32>
    %10 = arith.maximumf %8, %9 : vector<512x128xf32>
    %11 = vector.shape_cast %10 : vector<512x128xf32> to vector<2x256x128xf32>
    %cst_8 = arith.constant dense<0.000000e+00> : vector<2x128xf32>
    %12 = vector.multi_reduction <add>, %11, %cst_8 [1] : vector<2x256x128xf32> to vector<2x128xf32>
    %cst_9 = arith.constant 2.560000e+02 : f32
    %13 = vector.broadcast %cst_9 : f32 to vector<2x128xf32>
    %14 = arith.divf %12, %13 : vector<2x128xf32>
    %15 = arith.truncf %14 : vector<2x128xf32> to vector<2x128xbf16>
    %c0_10 = arith.constant 0 : index
    %c0_11 = arith.constant 0 : index
    %16 = vector.load %arg5[%c0_10, %c0_11] : memref<128x128xbf16, #tpu.memory_space<vmem>>, vector<128x128xbf16>
    %cst_12 = arith.constant dense<0.000000e+00> : vector<2x128xf32>
    %17 = tpu.matmul %15, %16, %cst_12 {dimension_numbers = #tpu.dot_dimension_numbers<[1], [0], [0], [1], [0, 0, 1, 1], [], []>} : vector<2x128xbf16>, vector<128x128xbf16>, vector<2x128xf32> -> vector<2x128xf32>
    %c0_13 = arith.constant 0 : index
    %c0_14 = arith.constant 0 : index
    %18 = vector.load %arg6[%c0_13, %c0_14] : memref<1x128xf32, #tpu.memory_space<vmem>>, vector<1x128xf32>
    %19 = vector.broadcast %18 : vector<1x128xf32> to vector<2x128xf32>
    %20 = arith.addf %17, %19 : vector<2x128xf32>
    %c0_15 = arith.constant 0 : index
    %c0_16 = arith.constant 0 : index
    %21 = vector.load %arg7[%c0_15, %c0_16] : memref<2x128xf32, #tpu.memory_space<vmem>>, vector<2x128xf32>
    tpu.vector_store %arg7[%c0_15, %c0_16], %20 {strides = array<i32>} : memref<2x128xf32, #tpu.memory_space<vmem>>, vector<2x128xf32>,
    return
  }
  func.func @transform_0(%arg0: i32) -> (i32, i32) {
    %c0_i32 = arith.constant 0 : i32
    %c0_i32_0 = arith.constant 0 : i32
    %c0_i32_1 = arith.constant 0 : i32
    return %c0_i32, %c0_i32_0 : i32, i32
  }
  func.func @transform_1(%arg0: i32) -> (i32, i32) {
    %c0_i32 = arith.constant 0 : i32
    %c0_i32_0 = arith.constant 0 : i32
    %c0_i32_1 = arith.constant 0 : i32
    return %c0_i32, %c0_i32_0 : i32, i32
  }
  func.func @transform_2(%arg0: i32) -> (i32, i32) {
    %c0_i32 = arith.constant 0 : i32
    %c0_i32_0 = arith.constant 0 : i32
    %c0_i32_1 = arith.constant 0 : i32
    return %c0_i32, %c0_i32_0 : i32, i32
  }
  func.func @transform_3(%arg0: i32) -> (i32, i32) {
    %c0_i32 = arith.constant 0 : i32
    %c0_i32_0 = arith.constant 0 : i32
    %c0_i32_1 = arith.constant 0 : i32
    return %c0_i32, %c0_i32_0 : i32, i32
  }
  func.func @transform_4(%arg0: i32) -> (i32, i32) {
    %c0_i32 = arith.constant 0 : i32
    %c0_i32_0 = arith.constant 0 : i32
    %c0_i32_1 = arith.constant 0 : i32
    return %c0_i32, %c0_i32_0 : i32, i32
  }
  func.func @transform_5(%arg0: i32) -> (i32, i32) {
    %c0_i32 = arith.constant 0 : i32
    %c0_i32_0 = arith.constant 0 : i32
    %c0_i32_1 = arith.constant 0 : i32
    return %c0_i32, %c0_i32_0 : i32, i32
  }
  func.func @transform_6(%arg0: i32) -> (i32, i32) {
    %c0_i32 = arith.constant 0 : i32
    %c0_i32_0 = arith.constant 0 : i32
    %c0_i32_1 = arith.constant 0 : i32
    return %c0_i32, %c0_i32_0 : i32, i32
  }
}

</mosaic_0001>

<bundles_post_ra>
// kernel: timm_model_forward.1
= control target key start
LH: loop header
LB: loop body
LE: loop exit
PB: predicated region body
PF: predicated region fallthrough
CT: control target
= control target key end

     0   :  { %s1776_s0 = inlined_call_operand.vmem [shape: bf16[512,128], index: 0, kind: input, shape index: {}]   ;;  %s1777_s1 = inlined_call_operand.vmem [shape: bf16[128,128], index: 1, kind: input, shape index: {}]   ;;  %s1778_s2 = inlined_call_operand.vmem [shape: f32[1,128], index: 2, kind: input, shape index: {}]   ;;  %s1779_s3 = inlined_call_operand.vmem [shape: f32[1,128], index: 3, kind: input, shape index: {}]   ;;  %s1780_s4 = inlined_call_operand.vmem [shape: bf16[128,128], index: 4, kind: input, shape index: {}]   ;;  %s1781_s5 = inlined_call_operand.vmem [shape: f32[1,128], index: 5, kind: input, shape index: {}]   ;;  %s1782_s6 = inlined_call_operand.hbm [shape: f32[2,128], index: 6, kind: output, shape index: {}]  }
   0x1   :  { %v1272_v0 = vld [vmem:[%s1777_s1] sm:$0xff]   ;;  %v1273_v1 = vld [vmem:[%s1777_s1 + $0x8] sm:$0xff]   ;;  %v1274_v2 = vld [vmem:[%s1777_s1 + $0x10] sm:$0xff]  }
   0x2   :  { %1153 = vmatprep.subr.bf16.mxu0 %v1272_v0  ;;  %1253 = vmatprep.subr.bf16.mxu1 %v1272_v0  ;;  %v1275_v3 = vld [vmem:[%s1777_s1 + $0x18] sm:$0xff]   ;;  %v1280_v4 = vld [vmem:[%s1776_s0] sm:$0xff]   ;;  %v1277_v6 = vld [vmem:[%s1777_s1 + $0x28] sm:$0xff]  }
   0x3   :  { %1154 = vmatpush3.bf16.msra.mxu0 %v1272_v0  ;;  %1261 = vmatpush3.bf16.msra.mxu1 %v1272_v0  ;;  %v1276_v5 = vld [vmem:[%s1777_s1 + $0x20] sm:$0xff]   ;;  %v1278_v7 = vld [vmem:[%s1777_s1 + $0x30] sm:$0xff]   ;;  %v1279_v8 = vld [vmem:[%s1777_s1 + $0x38] sm:$0xff]  }
   0x4   :  { %1155 = vmatprep.subr.bf16.mxu0 %v1273_v1  ;;  %1254 = vmatprep.subr.bf16.mxu1 %v1273_v1  ;;  %v1298_v9 = vld [vmem:[%s1776_s0 + $0x90] sm:$0xff]   ;;  %v1281_v10 = vld [vmem:[%s1776_s0 + $0x8] sm:$0xff]   ;;  %v1299_v12 = vld [vmem:[%s1776_s0 + $0x98] sm:$0xff]  }
   0x5   :  { %1169 = vmatprep.mubr.bf16.mxu0 %v1280_v4  ;;  %v1282_v11 = vld [vmem:[%s1776_s0 + $0x10] sm:$0xff]   ;;  %1205 = vmatprep.mubr.bf16.mxu1 %v1298_v9  ;;  %v1300_v13 = vld [vmem:[%s1776_s0 + $0xa0] sm:$0xff]   ;;  %v1283_v14 = vld [vmem:[%s1776_s0 + $0x18] sm:$0xff]  }
   0x6   :  { %v1284_v15 = vld [vmem:[%s1776_s0 + $0x20] sm:$0xff]   ;;  %v1301_v16 = vld [vmem:[%s1776_s0 + $0xa8] sm:$0xff]   ;;  %v1302_v17 = vld [vmem:[%s1776_s0 + $0xb0] sm:$0xff]  }
   0x7   :  { %1156 = vmatpush3.bf16.msra.mxu0 %v1273_v1  ;;  %1262 = vmatpush3.bf16.msra.mxu1 %v1273_v1 }
   0x8   :  { %1157 = vmatprep.subr.bf16.mxu0 %v1274_v2  ;;  %1255 = vmatprep.subr.bf16.mxu1 %v1274_v2 }
   0xb   :  { %1158 = vmatpush3.bf16.msra.mxu0 %v1274_v2  ;;  %1263 = vmatpush3.bf16.msra.mxu1 %v1274_v2 }
   0xc   :  { %1159 = vmatprep.subr.bf16.mxu0 %v1275_v3  ;;  %1256 = vmatprep.subr.bf16.mxu1 %v1275_v3 }
   0xf   :  { %1160 = vmatpush3.bf16.msra.mxu0 %v1275_v3  ;;  %1264 = vmatpush3.bf16.msra.mxu1 %v1275_v3 }
  0x10   :  { %1161 = vmatprep.subr.bf16.mxu0 %v1276_v5  ;;  %1257 = vmatprep.subr.bf16.mxu1 %v1276_v5 }
  0x13   :  { %1162 = vmatpush3.bf16.msra.mxu0 %v1276_v5  ;;  %1265 = vmatpush3.bf16.msra.mxu1 %v1276_v5 }
  0x14   :  { %1163 = vmatprep.subr.bf16.mxu0 %v1277_v6  ;;  %1258 = vmatprep.subr.bf16.mxu1 %v1277_v6 }
  0x17   :  { %1164 = vmatpush3.bf16.msra.mxu0 %v1277_v6  ;;  %1266 = vmatpush3.bf16.msra.mxu1 %v1277_v6 }
  0x18   :  { %1165 = vmatprep.subr.bf16.mxu0 %v1278_v7  ;;  %1259 = vmatprep.subr.bf16.mxu1 %v1278_v7 }
  0x1b   :  { %1166 = vmatpush3.bf16.msra.mxu0 %v1278_v7  ;;  %1267 = vmatpush3.bf16.msra.mxu1 %v1278_v7 }
  0x1c   :  { %1167 = vmatprep.subr.bf16.mxu0 %v1279_v8  ;;  %1260 = vmatprep.subr.bf16.mxu1 %v1279_v8 }
  0x1f   :  { %1168 = vmatpush3.bf16.msra.mxu0 %v1279_v8  ;;  %1268 = vmatpush3.bf16.msra.mxu1 %v1279_v8 }
  0x22   :  { %1170 = vmatmul.mubr.bf16.vlgmr.msra.gmra.mrb[0].mxu0 %v1281_v10  ;;  %1206 = vmatmul.mubr.bf16.vlgmr.msra.gmra.mrb[0].mxu1 %v1299_v12 }
  0x23   :  { %1173 = vmatprep.mubr.bf16.mxu0 %v1282_v11  ;;  %1209 = vmatprep.mubr.bf16.mxu1 %v1300_v13 }
  0x2a   :  { %1174 = vmatmul.mubr.bf16.gmra.mrb[4].mxu0 %v1283_v14  ;;  %1210 = vmatmul.mubr.bf16.gmra.mrb[4].mxu1 %v1301_v16 }
  0x2b   :  { %1177 = vmatprep.mubr.bf16.mxu0 %v1284_v15  ;;  %1213 = vmatprep.mubr.bf16.mxu1 %v1302_v17 }
  0x2c   :  { %11 = vsyncpa [#allocation3], 0  ;;  %v1285_v18 = vld [vmem:[%s1776_s0 + $0x28] sm:$0xff]   ;;  %v1303_v19 = vld [vmem:[%s1776_s0 + $0xb8] sm:$0xff]   ;;  %v1344_v41 = vmov 0.0   ;;  %vm1345_vm0 = vmmov 0  }
  0x2d   :  { %v1286_v20 = vld [vmem:[%s1776_s0 + $0x30] sm:$0xff]   ;;  %v1304_v21 = vld [vmem:[%s1776_s0 + $0xc0] sm:$0xff]   ;;  %v1287_v22 = vld [vmem:[%s1776_s0 + $0x38] sm:$0xff]   ;;  %1233 = vmatprep.subr.bf16.mxu1 %v1344_v41  ;;  %vm946_vm1 = vcmask 1041409   ;;  %s1346_s20 = smov [#allocation2]  }
  0x2e   :  { %v1305_v23 = vld [vmem:[%s1776_s0 + $0xc8] sm:$0xff]   ;;  %v1288_v24 = vld [vmem:[%s1776_s0 + $0x40] sm:$0xff]   ;;  %v1306_v25 = vld [vmem:[%s1776_s0 + $0xd0] sm:$0xff]   ;;  %s1045_s21 = sshll.u32 %s1346_s20, 4  ;;  %s1046_s21 = int_to_ptr.vmem [resolvable:$true] %s1045_s21 }
  0x2f   :  { %v1289_v26 = vld [vmem:[%s1776_s0 + $0x48] sm:$0xff]   ;;  %v1307_v27 = vld [vmem:[%s1776_s0 + $0xd8] sm:$0xff]   ;;  %v1290_v28 = vld [vmem:[%s1776_s0 + $0x50] sm:$0xff]   ;;  %s1320_s1 = scalar_lea.vmem %s1046_s21, 32  ;;  %p1325_p1 = scmp.lt.s32.totalorder %s1046_s21, %s1046_s21 }
  0x30   :  { %v1308_v29 = vld [vmem:[%s1776_s0 + $0xe0] sm:$0xff]   ;;  %v1291_v30 = vld [vmem:[%s1776_s0 + $0x58] sm:$0xff]   ;;  %v1309_v31 = vld [vmem:[%s1776_s0 + $0xe8] sm:$0xff]   ;;  %p1321_p0 = scmp.ne.s32.totalorder %s1046_s21, %s1320_s1  ;;  %p1326_p2 = scmp.lt.s32.totalorder %s1320_s1, %s1320_s1 }
  0x31   :  { %v1292_v32 = vld [vmem:[%s1776_s0 + $0x60] sm:$0xff]   ;;  %v1310_v33 = vld [vmem:[%s1776_s0 + $0xf0] sm:$0xff]   ;;  %v1293_v34 = vld [vmem:[%s1776_s0 + $0x68] sm:$0xff]  }
  0x32   :  { %1178 = vmatmul.mubr.bf16.gmra.mrb[8].mxu0 %v1285_v18  ;;  %1214 = vmatmul.mubr.bf16.gmra.mrb[8].mxu1 %v1303_v19  ;;  %v1311_v35 = vld [vmem:[%s1776_s0 + $0xf8] sm:$0xff]   ;;  %v1294_v36 = vld [vmem:[%s1776_s0 + $0x70] sm:$0xff]   ;;  %v1296_v38 = vld [vmem:[%s1776_s0 + $0x80] sm:$0xff]   ;;  %p1327_p3 = por %p1326_p2, %p1325_p1 }
  0x33   :  { %1181 = vmatprep.mubr.bf16.mxu0 %v1286_v20  ;;  %1217 = vmatprep.mubr.bf16.mxu1 %v1304_v21  ;;  %v1295_v37 = vld [vmem:[%s1776_s0 + $0x78] sm:$0xff]   ;;  %v1297_v39 = vld [vmem:[%s1776_s0 + $0x88] sm:$0xff]   ;;  %v1312_v40 = vld [vmem:[%s1780_s4] sm:$0xff]  }
  0x34   :  { %1234 = vmatpush3.bf16.msra.mxu1 %v1312_v40  ;;  %v1313_v42 = vld [vmem:[%s1780_s4 + $0x8] sm:$0xff]   ;;  %v1314_v43 = vld [vmem:[%s1780_s4 + $0x10] sm:$0xff]   ;;  %v1517_v44 = vld [vmem:[%s1778_s2] ss:$0 sm:$0xff]  ;;  %p1328_p4 = pnand %p1327_p3, %p1321_p0 }
  0x35   :  { %1235 = vmatprep.subr.bf16.mxu1 %v1344_v41  ;;  %v1525_v47 = vld [vmem:[%s1779_s3] ss:$0 sm:$0xff]  ;;  %v1315_v2 = vld [vmem:[%s1780_s4 + $0x18] sm:$0xff]  }
  0x36   :  { %v1316_v18 = vld [vmem:[%s1780_s4 + $0x20] sm:$0xff]  }
  0x38   :  { %1236 = vmatpush3.bf16.msra.mxu1 %v1313_v42 }
  0x39   :  { %1237 = vmatprep.subr.bf16.mxu1 %v1344_v41 }
  0x3a   :  { %1182 = vmatmul.mubr.bf16.gmra.mrb[12].mxu0 %v1287_v22  ;;  %1218 = vmatmul.mubr.bf16.gmra.mrb[12].mxu1 %v1305_v23 }
  0x3b   :  { %1185 = vmatprep.mubr.bf16.mxu0 %v1288_v24  ;;  %1221 = vmatprep.mubr.bf16.mxu1 %v1306_v25 }
  0x3c   :  { %1238 = vmatpush3.bf16.msra.mxu1 %v1314_v43 }
  0x3d   :  { %1239 = vmatprep.subr.bf16.mxu1 %v1344_v41 }
  0x40   :  { %1240 = vmatpush3.bf16.msra.mxu1 %v1315_v2 }
  0x41   :  { %1241 = vmatprep.subr.bf16.mxu1 %v1344_v41 }
  0x42   :  { %1186 = vmatmul.mubr.bf16.gmra.mrb[16].mxu0 %v1289_v26  ;;  %1222 = vmatmul.mubr.bf16.gmra.mrb[16].mxu1 %v1307_v27 }
  0x43   :  { %1189 = vmatprep.mubr.bf16.mxu0 %v1290_v28  ;;  %1225 = vmatprep.mubr.bf16.mxu1 %v1308_v29  ;;  %v1317_v28 = vld [vmem:[%s1780_s4 + $0x28] sm:$0xff]  }
  0x44   :  { %1242 = vmatpush3.bf16.msra.mxu1 %v1316_v18 }
  0x45   :  { %1243 = vmatprep.subr.bf16.mxu1 %v1344_v41 }
  0x48   :  { %1244 = vmatpush3.bf16.msra.mxu1 %v1317_v28 }
  0x49   :  { %1245 = vmatprep.subr.bf16.mxu1 %v1344_v41 }
  0x4a   :  { %1190 = vmatmul.mubr.bf16.gmra.mrb[20].mxu0 %v1291_v30  ;;  %1226 = vmatmul.mubr.bf16.gmra.mrb[20].mxu1 %v1309_v31 }
  0x4b   :  { %1193 = vmatprep.mubr.bf16.mxu0 %v1292_v32  ;;  %1229 = vmatprep.mubr.bf16.mxu1 %v1310_v33 }
  0x52   :  { %1194 = vmatmul.mubr.bf16.gmra.mrb[24].mxu0 %v1293_v34  ;;  %1230 = vmatmul.mubr.bf16.gmra.mrb[24].mxu1 %v1311_v35 }
  0x53   :  { %1197 = vmatprep.mubr.bf16.mxu0 %v1294_v36  ;;  %1249 = vmatprep.mubr.msk.bf16.mxu1 %vm1345_vm0, %v1344_v41 }
  0x5a   :  { %1198 = vmatmul.mubr.bf16.gmra.mrb[28].mxu0 %v1295_v37 }
  0x5b   :  { %1201 = vmatprep.mubr.bf16.mxu0 %v1296_v38 }
  0x62   :  { %1202 = vmatmul.mubr.bf16.gmra.mrb[32].mxu0 %v1297_v39 }
  0xf5   :  { %v1171_v45 = vpop.f32.mrb[0].mxu0  ;;  %v1520_v46 = vpop.f32.mrb[0].mxu1 }
  0xf6   :  { %v379_v48 = vpop.f32.mrb[1].mxu0  ;;  %v1527_v49 = vpop.f32.mrb[1].mxu1  ;;  %v643_v50 = vmul.f32 %v1171_v45, %v1517_v44 }
  0xf7   :  { %v641_v51 = vmul.f32 %v1517_v44, %v379_v48  ;;  %v1172_v52 = vpop.f32.mrb[2].mxu0  ;;  %v1531_v53 = vpop.f32.mrb[2].mxu1  ;;  %v1318_v48 = vld [vmem:[%s1780_s4 + $0x30] sm:$0xff]  }
  0xf8   :  { %v382_v54 = vpop.f32.mrb[3].mxu0  ;;  %v1533_v55 = vpop.f32.mrb[3].mxu1  ;;  %v644_v57 = vmul.f32 %v1172_v52, %v1517_v44  ;;  %v714_v59 = vadd.f32 %v1525_v47, %v643_v50  ;;  %1246 = vmatpush3.bf16.msra.mxu1 %v1318_v48 }
  0xf9   :  { %v712_v56 = vadd.f32 %v1525_v47, %v641_v51  ;;  %v642_v58 = vmul.f32 %v1517_v44, %v382_v54  ;;  %1247 = vmatprep.subr.bf16.mxu1 %v1344_v41 }
  0xfa   :  { %v715_v62 = vadd.f32 %v1525_v47, %v644_v57  ;;  %v778_v5 = vmax.f32 %v714_v59, 0.0 }
  0xfb   :  { %v713_v60 = vadd.f32 %v1525_v47, %v642_v58  ;;  %v776_v61 = vmax.f32 %v712_v56, 0.0 }
  0xfc   :  { %v779_v14 = vmax.f32 %v715_v62, 0.0 }
  0xfd   :  { %v777_v63 = vmax.f32 %v713_v60, 0.0  ;;  %v1175_v0 = vpop.f32.mrb[4].mxu0  ;;  %v1541_v1 = vpop.f32.mrb[4].mxu1 }
  0xfe   :  { %v395_v3 = vpop.f32.mrb[5].mxu0  ;;  %v1546_v4 = vpop.f32.mrb[5].mxu1  ;;  %v647_v7 = vmul.f32 %v1175_v0, %v1517_v44 }
  0xff   :  { %v840_v6 = vadd.f32 %v777_v63, %v776_v61  ;;  %v645_v8 = vmul.f32 %v1517_v44, %v395_v3  ;;  %v1176_v9 = vpop.f32.mrb[6].mxu0  ;;  %v1550_v10 = vpop.f32.mrb[6].mxu1  ;;  %v1319_v61 = vld [vmem:[%s1780_s4 + $0x38] sm:$0xff]  }
 0x100   :  { %v648_v11 = vmul.f32 %v1176_v9, %v1517_v44  ;;  %v398_v12 = vpop.f32.mrb[7].mxu0  ;;  %v1553_v13 = vpop.f32.mrb[7].mxu1  ;;  %v718_v19 = vadd.f32 %v1525_v47, %v647_v7  ;;  %1248 = vmatpush3.bf16.msra.mxu1 %v1319_v61 }
 0x101   :  { %v841_v15 = vadd.f32 %v840_v6, %v778_v5  ;;  %v716_v16 = vadd.f32 %v1525_v47, %v645_v8  ;;  %v646_v17 = vmul.f32 %v1517_v44, %v398_v12 }
 0x102   :  { %v719_v23 = vadd.f32 %v1525_v47, %v648_v11  ;;  %v782_v31 = vmax.f32 %v718_v19, 0.0 }
 0x103   :  { %v780_v20 = vmax.f32 %v716_v16, 0.0  ;;  %v842_v21 = vadd.f32 %v841_v15, %v779_v14  ;;  %v717_v22 = vadd.f32 %v1525_v47, %v646_v17 }
 0x104   :  { %v783_v37 = vmax.f32 %v719_v23, 0.0 }
 0x105   :  { %v843_v24 = vadd.f32 %v842_v21, %v780_v20  ;;  %v781_v25 = vmax.f32 %v717_v22, 0.0  ;;  %v1179_v26 = vpop.f32.mrb[8].mxu0  ;;  %v1565_v27 = vpop.f32.mrb[8].mxu1 }
 0x106   :  { %v411_v29 = vpop.f32.mrb[9].mxu0  ;;  %v1570_v30 = vpop.f32.mrb[9].mxu1  ;;  %v651_v33 = vmul.f32 %v1179_v26, %v1517_v44 }
 0x107   :  { %v844_v32 = vadd.f32 %v843_v24, %v781_v25  ;;  %v649_v34 = vmul.f32 %v1517_v44, %v411_v29  ;;  %v1180_v35 = vpop.f32.mrb[10].mxu0  ;;  %v1574_v36 = vpop.f32.mrb[10].mxu1 }
 0x108   :  { %v414_v38 = vpop.f32.mrb[11].mxu0  ;;  %v1576_v39 = vpop.f32.mrb[11].mxu1  ;;  %v652_v43 = vmul.f32 %v1180_v35, %v1517_v44  ;;  %v722_v50 = vadd.f32 %v1525_v47, %v651_v33 }
 0x109   :  { %v845_v40 = vadd.f32 %v844_v32, %v782_v31  ;;  %v720_v42 = vadd.f32 %v1525_v47, %v649_v34  ;;  %v650_v45 = vmul.f32 %v1517_v44, %v414_v38 }
 0x10a   :  { %v723_v57 = vadd.f32 %v1525_v47, %v652_v43  ;;  %v786_v0 = vmax.f32 %v722_v50, 0.0 }
 0x10b   :  { %v784_v51 = vmax.f32 %v720_v42, 0.0  ;;  %v846_v52 = vadd.f32 %v845_v40, %v783_v37  ;;  %v721_v54 = vadd.f32 %v1525_v47, %v650_v45 }
 0x10c   :  { %v787_v12 = vmax.f32 %v723_v57, 0.0 }
 0x10d   :  { %v847_v56 = vadd.f32 %v846_v52, %v784_v51  ;;  %v785_v58 = vmax.f32 %v721_v54, 0.0  ;;  %v1183_v59 = vpop.f32.mrb[12].mxu0  ;;  %v1589_v60 = vpop.f32.mrb[12].mxu1 }
 0x10e   :  { %v427_v62 = vpop.f32.mrb[13].mxu0  ;;  %v1594_v63 = vpop.f32.mrb[13].mxu1  ;;  %v655_v3 = vmul.f32 %v1183_v59, %v1517_v44 }
 0x10f   :  { %v848_v2 = vadd.f32 %v847_v56, %v785_v58  ;;  %v653_v5 = vmul.f32 %v1517_v44, %v427_v62  ;;  %v1184_v6 = vpop.f32.mrb[14].mxu0  ;;  %v1599_v7 = vpop.f32.mrb[14].mxu1 }
 0x110   :  { %v656_v8 = vmul.f32 %v1184_v6, %v1517_v44  ;;  %v430_v9 = vpop.f32.mrb[15].mxu0  ;;  %v1602_v11 = vpop.f32.mrb[15].mxu1  ;;  %v726_v16 = vadd.f32 %v1525_v47, %v655_v3 }
 0x111   :  { %v849_v14 = vadd.f32 %v848_v2, %v786_v0  ;;  %v724_v15 = vadd.f32 %v1525_v47, %v653_v5  ;;  %v654_v41 = vmul.f32 %v1517_v44, %v430_v9 }
 0x112   :  { %v727_v20 = vadd.f32 %v1525_v47, %v656_v8  ;;  %v790_v28 = vmax.f32 %v726_v16, 0.0 }
 0x113   :  { %v788_v17 = vmax.f32 %v724_v15, 0.0  ;;  %v850_v18 = vadd.f32 %v849_v14, %v787_v12  ;;  %v725_v19 = vadd.f32 %v1525_v47, %v654_v41 }
 0x114   :  { %v791_v35 = vmax.f32 %v727_v20, 0.0 }
 0x115   :  { %v851_v21 = vadd.f32 %v850_v18, %v788_v17  ;;  %v789_v22 = vmax.f32 %v725_v19, 0.0  ;;  %v1187_v23 = vpop.f32.mrb[16].mxu0  ;;  %v1609_v24 = vpop.f32.mrb[16].mxu1 }
 0x116   :  { %v443_v25 = vpop.f32.mrb[17].mxu0  ;;  %v1611_v26 = vpop.f32.mrb[17].mxu1  ;;  %v659_v31 = vmul.f32 %v1187_v23, %v1517_v44 }
 0x117   :  { %v852_v29 = vadd.f32 %v851_v21, %v789_v22  ;;  %v657_v32 = vmul.f32 %v1517_v44, %v443_v25  ;;  %v1188_v33 = vpop.f32.mrb[18].mxu0  ;;  %v1615_v34 = vpop.f32.mrb[18].mxu1 }
 0x118   :  { %v446_v37 = vpop.f32.mrb[19].mxu0  ;;  %v1617_v38 = vpop.f32.mrb[19].mxu1  ;;  %v660_v43 = vmul.f32 %v1188_v33, %v1517_v44  ;;  %v730_v48 = vadd.f32 %v1525_v47, %v659_v31 }
 0x119   :  { %v853_v40 = vadd.f32 %v852_v29, %v790_v28  ;;  %v728_v42 = vadd.f32 %v1525_v47, %v657_v32  ;;  %v658_v45 = vmul.f32 %v1517_v44, %v446_v37 }
 0x11a   :  { %v731_v56 = vadd.f32 %v1525_v47, %v660_v43  ;;  %v794_v0 = vmax.f32 %v730_v48, 0.0 }
 0x11b   :  { %v792_v50 = vmax.f32 %v728_v42, 0.0  ;;  %v854_v51 = vadd.f32 %v853_v40, %v791_v35  ;;  %v729_v52 = vadd.f32 %v1525_v47, %v658_v45 }
 0x11c   :  { %v795_v15 = vmax.f32 %v731_v56, 0.0 }
 0x11d   :  { %v855_v54 = vadd.f32 %v854_v51, %v792_v50  ;;  %v793_v57 = vmax.f32 %v729_v52, 0.0  ;;  %v1191_v58 = vpop.f32.mrb[20].mxu0  ;;  %v1625_v59 = vpop.f32.mrb[20].mxu1 }
 0x11e   :  { %v459_v61 = vpop.f32.mrb[21].mxu0  ;;  %v1627_v62 = vpop.f32.mrb[21].mxu1  ;;  %v663_v3 = vmul.f32 %v1191_v58, %v1517_v44 }
 0x11f   :  { %v856_v2 = vadd.f32 %v855_v54, %v793_v57  ;;  %v661_v5 = vmul.f32 %v1517_v44, %v459_v61  ;;  %v1192_v6 = vpop.f32.mrb[22].mxu0  ;;  %v1631_v8 = vpop.f32.mrb[22].mxu1 }
 0x120   :  { %v664_v9 = vmul.f32 %v1192_v6, %v1517_v44  ;;  %v462_v12 = vpop.f32.mrb[23].mxu0  ;;  %v1634_v14 = vpop.f32.mrb[23].mxu1  ;;  %v734_v18 = vadd.f32 %v1525_v47, %v663_v3 }
 0x121   :  { %v857_v41 = vadd.f32 %v856_v2, %v794_v0  ;;  %v732_v16 = vadd.f32 %v1525_v47, %v661_v5  ;;  %v662_v17 = vmul.f32 %v1517_v44, %v462_v12 }
 0x122   :  { %v735_v22 = vadd.f32 %v1525_v47, %v664_v9  ;;  %v798_v33 = vmax.f32 %v734_v18, 0.0 }
 0x123   :  { %v796_v19 = vmax.f32 %v732_v16, 0.0  ;;  %v858_v20 = vadd.f32 %v857_v41, %v795_v15  ;;  %v733_v21 = vadd.f32 %v1525_v47, %v662_v17 }
 0x124   :  { %v799_v45 = vmax.f32 %v735_v22, 0.0 }
 0x125   :  { %v859_v23 = vadd.f32 %v858_v20, %v796_v19  ;;  %v797_v25 = vmax.f32 %v733_v21, 0.0  ;;  %v1195_v28 = vpop.f32.mrb[24].mxu0  ;;  %v1641_v29 = vpop.f32.mrb[24].mxu1 }
 0x126   :  { %v475_v31 = vpop.f32.mrb[25].mxu0  ;;  %v1643_v32 = vpop.f32.mrb[25].mxu1  ;;  %v667_v37 = vmul.f32 %v1195_v28, %v1517_v44 }
 0x127   :  { %v860_v35 = vadd.f32 %v859_v23, %v797_v25  ;;  %v665_v40 = vmul.f32 %v1517_v44, %v475_v31  ;;  %v1196_v42 = vpop.f32.mrb[26].mxu0  ;;  %v1647_v43 = vpop.f32.mrb[26].mxu1 }
 0x128   :  { %v478_v48 = vpop.f32.mrb[27].mxu0  ;;  %v1649_v50 = vpop.f32.mrb[27].mxu1  ;;  %v668_v54 = vmul.f32 %v1196_v42, %v1517_v44  ;;  %v738_v57 = vadd.f32 %v1525_v47, %v667_v37 }
 0x129   :  { %v861_v51 = vadd.f32 %v860_v35, %v798_v33  ;;  %v736_v52 = vadd.f32 %v1525_v47, %v665_v40  ;;  %v666_v56 = vmul.f32 %v1517_v44, %v478_v48 }
 0x12a   :  { %v739_v3 = vadd.f32 %v1525_v47, %v668_v54  ;;  %v802_v12 = vmax.f32 %v738_v57, 0.0 }
 0x12b   :  { %v800_v58 = vmax.f32 %v736_v52, 0.0  ;;  %v862_v61 = vadd.f32 %v861_v51, %v799_v45  ;;  %v737_v0 = vadd.f32 %v1525_v47, %v666_v56 }
 0x12c   :  { %v803_v20 = vmax.f32 %v739_v3, 0.0 }
 0x12d   :  { %v863_v2 = vadd.f32 %v862_v61, %v800_v58  ;;  %v801_v5 = vmax.f32 %v737_v0, 0.0  ;;  %v1199_v6 = vpop.f32.mrb[28].mxu0  ;;  %v677_v61 = vmul.f32 %v1517_v44, %v1527_v49  ;;  %v678_v49 = vmul.f32 %v1517_v44, %v1533_v55 }
 0x12e   :  { %v491_v9 = vpop.f32.mrb[29].mxu0  ;;  %v671_v41 = vmul.f32 %v1199_v6, %v1517_v44 }
 0x12f   :  { %v864_v15 = vadd.f32 %v863_v2, %v801_v5  ;;  %v669_v16 = vmul.f32 %v1517_v44, %v491_v9  ;;  %v1200_v17 = vpop.f32.mrb[30].mxu0 }
 0x130   :  { %v672_v18 = vmul.f32 %v1200_v17, %v1517_v44  ;;  %v494_v19 = vpop.f32.mrb[31].mxu0  ;;  %v742_v25 = vadd.f32 %v1525_v47, %v671_v41 }
 0x131   :  { %v865_v21 = vadd.f32 %v864_v15, %v802_v12  ;;  %v740_v22 = vadd.f32 %v1525_v47, %v669_v16  ;;  %v670_v23 = vmul.f32 %v1517_v44, %v494_v19  ;;  %v748_v15 = vadd.f32 %v1525_v47, %v677_v61 }
 0x132   :  { %v743_v35 = vadd.f32 %v1525_v47, %v672_v18  ;;  %v806_v48 = vmax.f32 %v742_v25, 0.0 }
 0x133   :  { %v804_v28 = vmax.f32 %v740_v22, 0.0  ;;  %v866_v31 = vadd.f32 %v865_v21, %v803_v20  ;;  %v741_v33 = vadd.f32 %v1525_v47, %v670_v23  ;;  %v679_v20 = vmul.f32 %v1520_v46, %v1517_v44 }
 0x134   :  { %v807_v57 = vmax.f32 %v743_v35, 0.0  ;;  %v812_v21 = vmax.f32 %v748_v15, 0.0  ;;  %v680_v22 = vmul.f32 %v1531_v53, %v1517_v44 }
 0x135   :  { %v867_v37 = vadd.f32 %v866_v31, %v804_v28  ;;  %v805_v40 = vmax.f32 %v741_v33, 0.0  ;;  %v1203_v42 = vpop.f32.mrb[32].mxu0  ;;  %v749_v28 = vadd.f32 %v1525_v47, %v678_v49  ;;  %v681_v31 = vmul.f32 %v1517_v44, %v1546_v4 }
 0x136   :  { %v507_v45 = vpop.f32.mrb[33].mxu0  ;;  %v675_v52 = vmul.f32 %v1203_v42, %v1517_v44  ;;  %v750_v33 = vadd.f32 %v1525_v47, %v679_v20  ;;  %v751_v55 = vadd.f32 %v1525_v47, %v680_v22  ;;  %v682_v42 = vmul.f32 %v1517_v44, %v1553_v13 }
 0x137   :  { %v868_v51 = vadd.f32 %v867_v37, %v805_v40  ;;  %v673_v54 = vmul.f32 %v1517_v44, %v507_v45  ;;  %v1204_v56 = vpop.f32.mrb[34].mxu0  ;;  %v813_v40 = vmax.f32 %v749_v28, 0.0  ;;  %v752_v46 = vadd.f32 %v1525_v47, %v681_v31 }
 0x138   :  { %v510_v58 = vpop.f32.mrb[35].mxu0  ;;  %v676_v3 = vmul.f32 %v1204_v56, %v1517_v44  ;;  %v746_v9 = vadd.f32 %v1525_v47, %v675_v52  ;;  %v814_v53 = vmax.f32 %v750_v33, 0.0  ;;  %v684_v4 = vmul.f32 %v1550_v10, %v1517_v44 }
 0x139   :  { %v869_v0 = vadd.f32 %v868_v51, %v806_v48  ;;  %v744_v2 = vadd.f32 %v1525_v47, %v673_v54  ;;  %v674_v5 = vmul.f32 %v1517_v44, %v510_v58  ;;  %v683_v48 = vmul.f32 %v1541_v1, %v1517_v44 }
 0x13a   :  { %v747_v16 = vadd.f32 %v1525_v47, %v676_v3  ;;  %v810_v18 = vmax.f32 %v746_v9, 0.0  ;;  %v815_v51 = vmax.f32 %v751_v55, 0.0  ;;  %v816_v54 = vmax.f32 %v752_v46, 0.0 }
 0x13b   :  { %v1672_v6 = vadd.f32 %v869_v0, %v807_v57  ;;  %v745_v12 = vadd.f32 %v1525_v47, %v674_v5  ;;  %v808_v41 = vmax.f32 %v744_v2, 0.0  ;;  %v753_v56 = vadd.f32 %v1525_v47, %v682_v42 }
 0x13c   :  { %v811_v23 = vmax.f32 %v747_v16, 0.0  ;;  %v685_v57 = vmul.f32 %v1517_v44, %v1570_v30  ;;  %v754_v58 = vadd.f32 %v1525_v47, %v683_v48  ;;  %v755_v13 = vadd.f32 %v1525_v47, %v684_v4 }
 0x13d   :  { %v809_v17 = vmax.f32 %v745_v12, 0.0  ;;  %v817_v2 = vmax.f32 %v753_v56, 0.0  ;;  %v686_v3 = vmul.f32 %v1517_v44, %v1576_v39  ;;  %v687_v9 = vmul.f32 %v1565_v27, %v1517_v44 }
 0x13e   :  { %v756_v1 = vadd.f32 %v1525_v47, %v685_v57  ;;  %v818_v10 = vmax.f32 %v754_v58, 0.0  ;;  %v819_v12 = vmax.f32 %v755_v13, 0.0  ;;  %v688_v30 = vmul.f32 %v1574_v36, %v1517_v44 }
 0x13f   :  { %v877_v19 = vadd.f32 %v809_v17, %v808_v41  ;;  %v757_v16 = vadd.f32 %v1525_v47, %v686_v3  ;;  %v689_v17 = vmul.f32 %v1517_v44, %v1594_v63  ;;  %v758_v49 = vadd.f32 %v1525_v47, %v687_v9 }
 0x140   :  { %v820_v41 = vmax.f32 %v756_v1, 0.0  ;;  %v759_v39 = vadd.f32 %v1525_v47, %v688_v30  ;;  %v692_v63 = vmul.f32 %v1599_v7, %v1517_v44  ;;  %v694_v42 = vmul.f32 %v1517_v44, %v1617_v38 }
 0x141   :  { %v878_v25 = vadd.f32 %v877_v19, %v810_v18  ;;  %v821_v20 = vmax.f32 %v757_v16, 0.0  ;;  %v760_v27 = vadd.f32 %v1525_v47, %v689_v17  ;;  %v822_v36 = vmax.f32 %v758_v49, 0.0 }
 0x142   :  { %v698_v38 = vmul.f32 %v1517_v44, %v1634_v14  ;;  %v701_v14 = vmul.f32 %v1517_v44, %v1643_v32 }
 0x143   :  { %v879_v35 = vadd.f32 %v878_v25, %v811_v23  ;;  %v691_v23 = vmul.f32 %v1589_v60, %v1517_v44  ;;  %v823_v25 = vmax.f32 %v759_v39, 0.0  ;;  %v824_v31 = vmax.f32 %v760_v27, 0.0 }
 0x144   :  { %v769_v1 = vadd.f32 %v1525_v47, %v698_v38  ;;  %v772_v16 = vadd.f32 %v1525_v47, %v701_v14  ;;  %v704_v39 = vmul.f32 %v1647_v43, %v1517_v44 }
 0x145   :  { %v880_v37 = vadd.f32 %v879_v35, %v812_v21  ;;  %v690_v21 = vmul.f32 %v1517_v44, %v1602_v11  ;;  %v693_v35 = vmul.f32 %v1517_v44, %v1611_v26  ;;  %v762_v55 = vadd.f32 %v1525_v47, %v691_v23 }
 0x146   :  { %v763_v11 = vadd.f32 %v1525_v47, %v692_v63  ;;  %v696_v26 = vmul.f32 %v1615_v34, %v1517_v44  ;;  %v836_v27 = vmax.f32 %v772_v16, 0.0 }
 0x147   :  { %v881_v45 = vadd.f32 %v880_v37, %v813_v40  ;;  %v761_v33 = vadd.f32 %v1525_v47, %v690_v21  ;;  %v764_v60 = vadd.f32 %v1525_v47, %v693_v35  ;;  %v826_v7 = vmax.f32 %v762_v55, 0.0 }
 0x148   :  { %v827_v48 = vmax.f32 %v763_v11, 0.0 }
 0x149   :  { %v882_v52 = vadd.f32 %v881_v45, %v814_v53  ;;  %v825_v46 = vmax.f32 %v761_v33, 0.0  ;;  %v695_v45 = vmul.f32 %v1609_v24, %v1517_v44  ;;  %v828_v4 = vmax.f32 %v764_v60, 0.0 }
 0x14a   :  { %v767_v24 = vadd.f32 %v1525_v47, %v696_v26 }
 0x14b   :  { %v883_v61 = vadd.f32 %v882_v52, %v815_v51  ;;  %v765_v52 = vadd.f32 %v1525_v47, %v694_v42  ;;  %v766_v56 = vadd.f32 %v1525_v47, %v695_v45 }
 0x14c   :  { %v831_v3 = vmax.f32 %v767_v24, 0.0 }
 0x14d   :  { %v884_v0 = vadd.f32 %v883_v61, %v816_v54  ;;  %v697_v54 = vmul.f32 %v1517_v44, %v1627_v62  ;;  %v829_v61 = vmax.f32 %v765_v52, 0.0  ;;  %v830_v34 = vmax.f32 %v766_v56, 0.0 }
 0x14e   :  { %v700_v62 = vmul.f32 %v1631_v8, %v1517_v44  ;;  %v702_v8 = vmul.f32 %v1517_v44, %v1649_v50 }
 0x14f   :  { %v885_v5 = vadd.f32 %v884_v0, %v817_v2  ;;  %v768_v13 = vadd.f32 %v1525_v47, %v697_v54  ;;  %v699_v2 = vmul.f32 %v1625_v59, %v1517_v44 }
 0x150   :  { %v771_v30 = vadd.f32 %v1525_v47, %v700_v62  ;;  %v773_v21 = vadd.f32 %v1525_v47, %v702_v8 }
 0x151   :  { %v886_v15 = vadd.f32 %v885_v5, %v818_v10  ;;  %v832_v5 = vmax.f32 %v768_v13, 0.0  ;;  %v770_v9 = vadd.f32 %v1525_v47, %v699_v2 }
 0x152   :  { %v835_v32 = vmax.f32 %v771_v30, 0.0  ;;  %v837_v63 = vmax.f32 %v773_v21, 0.0 }
 0x153   :  { %v887_v18 = vadd.f32 %v886_v15, %v819_v12  ;;  %v833_v15 = vmax.f32 %v769_v1, 0.0  ;;  %v834_v17 = vmax.f32 %v770_v9, 0.0 }
 0x155   :  { %v888_v19 = vadd.f32 %v887_v18, %v820_v41  ;;  %v871_v41 = vrot.slane %v1672_v6, 4  ;;  %v703_v18 = vmul.f32 %v1641_v29, %v1517_v44 }
 0x157   :  { %v889_v22 = vadd.f32 %v888_v19, %v821_v20  ;;  %v872_v19 = vadd.f32 %v871_v41, %v1672_v6 }
 0x159   :  { %v890_v28 = vadd.f32 %v889_v22, %v822_v36  ;;  %v774_v36 = vadd.f32 %v1525_v47, %v703_v18  ;;  %v873_v23 = vrot.slane %v872_v19, 2 }
 0x15b   :  { %v891_v37 = vadd.f32 %v890_v28, %v823_v25  ;;  %v775_v25 = vadd.f32 %v1525_v47, %v704_v39  ;;  %v838_v28 = vmax.f32 %v774_v36, 0.0 }
 0x15d   :  { %v892_v40 = vadd.f32 %v891_v37, %v824_v31  ;;  %v874_v31 = vadd.f32 %v873_v23, %v872_v19  ;;  %v839_v33 = vmax.f32 %v775_v25, 0.0 }
 0x15f   :  { %v893_v53 = vadd.f32 %v892_v40, %v825_v46  ;;  %v875_v43 = vrot.slane %v874_v31, 1 }
 0x161   :  { %v894_v51 = vadd.f32 %v893_v53, %v826_v7  ;;  %v876_v37 = vadd.f32 %v875_v43, %v874_v31 }
 0x163   :  { %v895_v57 = vadd.f32 %v894_v51, %v827_v48  ;;  %v915_v46 = vmul.f32 0.00390625, %v876_v37 }
 0x165   :  { %v896_v58 = vadd.f32 %v895_v57, %v828_v4  ;;  %v917_v7 = vpack.c.bf16 %v915_v46, %v915_v46  ;;  %v1095_v4 = vld [vmem:[%s1781_s5] ss:$0 sm:$0xff] }
 0x167   :  { %v897_v0 = vadd.f32 %v896_v58, %v829_v61  ;;  %v944_v47 = vunpack.c.l.b16 %v917_v7 }
 0x169   :  { %v898_v10 = vadd.f32 %v897_v0, %v830_v34 }
 0x16b   :  { %v899_v12 = vadd.f32 %v898_v10, %v831_v3 }
 0x16d   :  { %v900_v59 = vadd.f32 %v899_v12, %v832_v5 }
 0x16f   :  { %v901_v49 = vadd.f32 %v900_v59, %v833_v15 }
 0x171   :  { %v902_v20 = vadd.f32 %v901_v49, %v834_v17 }
 0x173   :  { %v903_v22 = vadd.f32 %v902_v20, %v835_v32 }
 0x175   :  { %v904_v50 = vadd.f32 %v903_v22, %v836_v27 }
 0x177   :  { %v905_v29 = vadd.f32 %v904_v50, %v837_v63 }
 0x179   :  { %v906_v35 = vadd.f32 %v905_v29, %v838_v28 }
 0x17b   :  { %v907_v44 = vadd.f32 %v906_v35, %v839_v33 }
 0x17d   :  { %v908_v6 = vrot.slane %v907_v44, 4 }
 0x17f   :  { %v909_v55 = vadd.f32 %v908_v6, %v907_v44 }
 0x181   :  { %v910_v11 = vrot.slane %v909_v55, 2 }
 0x183   :  { %v911_v40 = vadd.f32 %v910_v11, %v909_v55 }
 0x185   :  { %v912_v60 = vrot.slane %v911_v40, 1 }
 0x187   :  { %v913_v42 = vadd.f32 %v912_v60, %v911_v40 }
 0x189   :  { %v916_v53 = vmul.f32 0.00390625, %v913_v42 }
 0x18b   :  { %v918_v45 = vpack.c.bf16 %v916_v53, %v916_v53 }
 0x18d   :  { %v945_v48 = vunpack.c.l.b16 %v918_v45 }
 0x18f   :  { %v947_v26 = vsel %vm946_vm1, %v945_v48, %v944_v47 }
 0x190   :  { %v948_v51 = vpack.c.b16 %v947_v26, %v947_v26 }
 0x192   :  { %1250 = vmatmul.mubr.bf16.vlgmr.msra.gmra.mrb[28].mxu1 %v948_v51 }
 0x265   :  { %v1032_v52 = vpop.f32.mrb[28].mxu1 }
 0x266   :  { %v1033_v54 = vadd.f32 %v1095_v4, %v1032_v52  ;;  %v1251_v56 = vpop.f32.mrb[29].mxu1 }
 0x267   :  { %v1035_v57 = vpop.f32.mrb[30].mxu1 }
 0x268   :  { %1038 = vst [vmem:[#allocation2] sm:$0x3] %v1033_v54  ;;  %v1252_v38 = vpop.f32.mrb[31].mxu1 }
 0x269   :  { %1331 = shalt.err (!%p1328_p4)
}
 0x26a   :  { %s1332_s5 = scalar_lea.hbm %s1782_s6, 32 }
 0x26b   :  { %p1333_p5 = scmp.ne.s32.totalorder %s1782_s6, %s1332_s5  ;;  %p1336_p6 = scmp.lt.u32.totalorder %s1332_s5, %s1782_s6 }
 0x26d   :  { %p1338_p7 = pnand %p1336_p6, %p1333_p5 }
 0x26f   :  { %1341 = shalt.err (!%p1338_p7)
}
 0x270   :  { %1048 = dma.vmem_to_hbm [thread:$0]  %s1046_s21, 32, %s1782_s6, [#allocation3]  }
 0x271   :  { %1342 = dma.done.wait [#allocation3], 32  }
 0x272   :  { %1343 = vsyncadd [#allocation3], 4294967264 }
 0x273   :  { %1052 = vsyncpa [#allocation3], 1 }

</bundles_post_ra>
